<compile_context>
chip_gen: v7x
topology: tpu7x:2x2x1
jax: 0.10.0
libtpu: 0.0.40
codegen_flags: <defaults>
</compile_context>

<pallas_src>
import functools

import jax
import jax.numpy as jnp
from jax.experimental import pallas as pl
from jax.experimental.pallas import tpu as pltpu

LANES = 128
SUBLANES = 8
_N_CHANNELS = 7          # [deltas_xyz, normals_mean_xyz, coeff]


def _round_up(x, m):
    return ((x + m - 1) // m) * m


def _detect_num_tensorcores():
    """2 on v7x (two TensorCores per chip), else 1 (v5e / v6e / fallback)."""
    try:
        dev = jax.devices()[0]
        if dev.platform != "tpu":
            return 1
        kind = (getattr(dev, "device_kind", "") or "").lower().replace(" ", "")
        if "v7" in kind or "7x" in kind:
            return 2
    except Exception:
        pass
    return 1


def _friction_kernel(slab_ref, per_vert_ref, loss_ref, *, eps, scale):
    # slab_ref : (7, TR, 128); channels = [d_x, d_y, d_z, nm_x, nm_y, nm_z, coeff]
    #   d     = curr - (prev + (nn_points_prev_curr - nn_points_prev))
    #   nm    = (nn_normals_prev + nn_normals_curr) / 2
    #   coeff = v_mass * mask * g * mu   (zero on padded lanes -> friction 0)
    # per_vert_ref: (TR, 128)
    # loss_ref    : (1, 8, 128) grid-resident per-core partial-sum accumulator.

    @pl.when(pl.program_id(1) == 0)
    def _init():
        loss_ref[...] = jnp.zeros_like(loss_ref)

    d0, d1, d2 = slab_ref[0], slab_ref[1], slab_ref[2]
    n0, n1, n2 = slab_ref[3], slab_ref[4], slab_ref[5]
    coeff = slab_ref[6]

    # project out the component along the mean normal, keep the in-plane part
    dot = d0 * n0 + d1 * n1 + d2 * n2
    p0 = d0 - dot * n0
    p1 = d1 - dot * n1
    p2 = d2 - dot * n2

    inplane2 = p0 * p0 + p1 * p1
    norm2 = inplane2 + p2 * p2
    dist = jnp.sqrt(norm2)

    # |1 - (|p_z| / max(||p||, 1e-8))^2|  ==  (p_x^2 + p_y^2) / ||p||^2.
    # Intentional divergence from the reference when ||p|| < 1e-8 (reference
    # value ~1, ours ~0); friction is multiplied by dist ~ 0 there, so the
    # contribution is 0 either way.
    cos_plane = inplane2 * pl.reciprocal(jnp.maximum(norm2, 1e-16))
    cos2floor = jnp.sqrt(cos_plane + eps)

    friction = coeff * cos2floor * dist          # padded lanes: coeff == 0

    per_vert_ref[...] = friction * scale

    # vreg-shaped partial accumulation: sublane-aligned (8,128) slices summed
    # with a VPU add tree; no cross-lane XLU reduce, no scalar broadcast.
    tr = friction.shape[0]
    parts = [friction[r * SUBLANES:(r + 1) * SUBLANES, :]
             for r in range(tr // SUBLANES)]
    while len(parts) > 1:
        nxt = [parts[i] + parts[i + 1] for i in range(0, len(parts) - 1, 2)]
        if len(parts) % 2:
            nxt.append(parts[-1])
        parts = nxt
    loss_ref[...] += parts[0][None]


def friction_energy(curr_pos, prev_pos,
                    nn_points_prev, nn_points_prev_curr,
                    nn_normals_prev, nn_normals_curr,
                    nn_dist_prev, nn_dist_curr,
                    v_mass, *,
                    B, weight=1.0, g=9.81, mu=1.0,
                    friction_radius=0.003, eps=1e-4,
                    tile_rows=None, num_cores=None):
    """Vectors: [N,3]; nn_dist_*: [N,1]; v_mass: [N,1]."""
    N = curr_pos.shape[0]
    NR = pl.cdiv(N, LANES)               # rows of 128 lane-dense vertices

    # ---- grid shape -------------------------------------------------------
    # Leading "parallel" axis -> TensorCore split; only v7x has 2 TCs.
    NC = _detect_num_tensorcores() if num_cores is None else int(num_cores)
    NC = min(NC, max(1, NR // SUBLANES))          # don't split tiny problems
    if tile_rows is None:
        # 32 B/vertex kernel traffic: TR=2048 is ~7 MiB/step per input buffer.
        # Cap 1024 on v7x (64 MiB VMEM), 2048 on v5e/v6e (128 MiB VMEM).
        tile_rows = 1024 if NC > 1 else 2048
    # Adaptive TR: bound row padding while keeping >= ~8 steps per core so the
    # double-buffered pipeline actually overlaps on large N.
    MIN_STEPS = 8
    TR = min(int(tile_rows), _round_up(pl.cdiv(NR, NC * MIN_STEPS), SUBLANES))
    TR = max(_round_up(TR, SUBLANES), SUBLANES)
    TPC = pl.cdiv(NR, TR * NC)            # "arbitrary" row-tile steps per core
    NRtot = TPC * TR * NC
    Npad = NRtot * LANES

    scale = float(weight) / float(B)

    # ---- slab formation (fused with the vector/scalar combining math) -----
    # TODO(synk): have the upstream knn/gather producer emit this lane-dense,
    # component-major (7, NRtot, 128) slab directly; building it here still
    # re-reads every input (~88 B/vertex) once outside the kernel.
    f32 = jnp.float32
    deltas = (curr_pos.astype(f32)
              - (prev_pos.astype(f32)
                 + (nn_points_prev_curr.astype(f32)
                    - nn_points_prev.astype(f32))))              # ref FP order
    normals_mean = (nn_normals_prev.astype(f32)
                    + nn_normals_curr.astype(f32)) * 0.5
    mask = jnp.logical_and(nn_dist_prev[:, 0] < friction_radius,
                           nn_dist_curr[:, 0] < friction_radius)
    # NOTE: padded lanes rely on coeff being zero-padded (=> friction == 0).
    # coeff multiply order differs from the reference by a couple of ulps.
    coeff = v_mass[:, 0].astype(f32) * mask.astype(f32) * (float(g) * float(mu))

    chans = jnp.concatenate([deltas.T, normals_mean.T, coeff[None]], axis=0)
    slab = jnp.pad(chans, ((0, 0), (0, Npad - N))).reshape(
        _N_CHANNELS, NRtot, LANES)

    kernel = functools.partial(_friction_kernel, eps=float(eps), scale=scale)

    slab_spec = pl.BlockSpec((_N_CHANNELS, TR, LANES),
                             lambda c, i: (0, c * TPC + i, 0))
    pv_spec = pl.BlockSpec((TR, LANES), lambda c, i: (c * TPC + i, 0))
    loss_spec = pl.BlockSpec((1, SUBLANES, LANES), lambda c, i: (c, 0, 0))
    # TODO(synk): on v7x, if per-step DMA issue latency shows up at 3.2 TB/s,
    # prefer pipeline_mode=pl.Buffered(3) on slab_spec over growing TR.

    vmem_limit = (64 if NC == 1 else 32) * 1024 * 1024

    per_vert_pad, loss_parts = pl.pallas_call(
        kernel,
        out_shape=(jax.ShapeDtypeStruct((NRtot, LANES), jnp.float32),
                   jax.ShapeDtypeStruct((NC, SUBLANES, LANES), jnp.float32)),
        grid_spec=pltpu.PrefetchScalarGridSpec(
            num_scalar_prefetch=0,
            grid=(NC, TPC),
            in_specs=[slab_spec],
            out_specs=(pv_spec, loss_spec)),
        compiler_params=pltpu.CompilerParams(
            dimension_semantics=("parallel", "arbitrary"),
            vmem_limit_bytes=vmem_limit),
    )(slab)

    loss = jnp.sum(loss_parts) * scale           # raw partials scaled once
    per_vert = per_vert_pad.reshape(-1)[:N]
    return dict(loss=loss, per_vert=per_vert)


def _reference(curr, prev, npp, nppc, nnp, nnc, dprev, dcurr, vmass, *,
               B, weight, g, mu, friction_radius, eps):
    nm = (nnp + nnc) / 2.0
    mask = jnp.logical_and(dprev < friction_radius,
                           dcurr < friction_radius)[..., 0].astype(jnp.float32)
    deltas = curr - (prev + (nppc - npp))
    nproj = (deltas * nm).sum(-1, keepdims=True) * nm
    dp = deltas - nproj
    dist = jnp.linalg.norm(dp, axis=-1)
    cos_normal = jnp.abs(dp[..., 2]) / jnp.maximum(dist, 1e-8)
    cos2floor = jnp.sqrt(jnp.abs(1.0 - cos_normal ** 2) + eps)
    friction = vmass[:, 0] * cos2floor * g * dist * mask * mu
    loss = friction.sum() * weight / B
    return loss, friction * weight / B


def _make_inputs(key, N):
    ks = jax.random.split(key, 9)
    curr_pos = jax.random.normal(ks[0], (N, 3), jnp.float32) * 0.1
    prev_pos = curr_pos + jax.random.normal(ks[1], (N, 3), jnp.float32) * 0.01
    nn_points_prev = jax.random.normal(ks[2], (N, 3), jnp.float32) * 0.1
    nn_points_prev_curr = nn_points_prev + \
        jax.random.normal(ks[3], (N, 3), jnp.float32) * 0.005
    nrm_p = jax.random.normal(ks[4], (N, 3), jnp.float32)
    nrm_c = jax.random.normal(ks[5], (N, 3), jnp.float32)
    nn_normals_prev = nrm_p / jnp.linalg.norm(nrm_p, axis=-1, keepdims=True)
    nn_normals_curr = nrm_c / jnp.linalg.norm(nrm_c, axis=-1, keepdims=True)
    nn_dist_prev = jax.random.uniform(ks[6], (N, 1), jnp.float32) * 0.006
    nn_dist_curr = jax.random.uniform(ks[7], (N, 1), jnp.float32) * 0.006
    v_mass = jax.random.uniform(ks[8], (N, 1), jnp.float32) * 1e-3 + 1e-4
    return (curr_pos, prev_pos, nn_points_prev, nn_points_prev_curr,
            nn_normals_prev, nn_normals_curr, nn_dist_prev, nn_dist_curr,
            v_mass)


if __name__ == "__main__":
    key = jax.random.PRNGKey(0)
    params = dict(B=2, weight=1.0, g=9.81, mu=1.0,
                  friction_radius=0.003, eps=1e-4)

    # case 1: tiny single-block path (auto tile/core selection).
    # case 2: N not a multiple of 128 with a tiny tile so the multi-step
    #         "arbitrary" axis, loss accumulator and zero-padding are exercised.
    # case 3: forced 2-core grid so the v7x (NC=2) indexing path is tested on
    #         any chip (serialized "parallel" axis on single-TC parts).
    cases = [
        (2 * LANES, dict()),
        (33 * LANES + 17, dict(tile_rows=8)),
        (17 * LANES + 5, dict(tile_rows=16, num_cores=2)),
    ]
    for idx, (N, kw) in enumerate(cases):
        inputs = _make_inputs(jax.random.fold_in(key, idx), N)
        out = friction_energy(*inputs, **kw, **params)
        jax.block_until_ready(out)

        ref_loss, ref_pv = _reference(*inputs, **params)
        assert jnp.allclose(out["loss"], ref_loss, rtol=1e-4, atol=1e-8), \
            (N, float(out["loss"]), float(ref_loss))
        assert jnp.allclose(out["per_vert"], ref_pv, rtol=1e-5, atol=1e-8), \
            (N, float(jnp.max(jnp.abs(out["per_vert"] - ref_pv))))

    print("KERNEL_OK")
</pallas_src>

<mosaic_0001>
module attributes {stable_mosaic.version = 11 : i64} {
  func.func @_friction_kernel(%arg0: i32, %arg1: i32, %arg2: memref<7x8x128xf32, #tpu.memory_space<vmem>>, %arg3: memref<8x128xf32, #tpu.memory_space<vmem>>, %arg4: memref<1x8x128xf32, #tpu.memory_space<vmem>>) attributes {dimension_semantics = [#tpu.dimension_semantics<parallel>, #tpu.dimension_semantics<arbitrary>], iteration_bounds = array<i64: 1, 1>, scalar_prefetch = 0 : i64, scratch_operands = 0 : i64, tpu.core_type = #tpu.core_type<tc>, window_params = [{transform_indices = @transform_0, window_bounds = array<i64: 7, 8, 128>}, {transform_indices = @transform_1, window_bounds = array<i64: 8, 128>}, {transform_indices = @transform_2, window_bounds = array<i64: 1, 8, 128>}]} {
    %c0_i32 = arith.constant 0 : i32
    %0 = arith.cmpi eq, %arg1, %c0_i32 : i32
    %1 = arith.extui %0 : i1 to i32
    %c0_i32_0 = arith.constant 0 : i32
    %2 = arith.cmpi ne, %1, %c0_i32_0 : i32
    scf.if %2 {
      %cst_25 = arith.constant 0.000000e+00 : f32
      %50 = vector.broadcast %cst_25 : f32 to vector<1x8x128xf32>
      %c0_26 = arith.constant 0 : index
      %c0_27 = arith.constant 0 : index
      %c0_28 = arith.constant 0 : index
      %51 = vector.load %arg4[%c0_26, %c0_27, %c0_28] : memref<1x8x128xf32, #tpu.memory_space<vmem>>, vector<1x8x128xf32>
      tpu.vector_store %arg4[%c0_26, %c0_27, %c0_28], %50 {strides = array<i32>} : memref<1x8x128xf32, #tpu.memory_space<vmem>>, vector<1x8x128xf32>,
    } else {
    }
    %c0 = arith.constant 0 : index
    %c0_1 = arith.constant 0 : index
    %c0_2 = arith.constant 0 : index
    %3 = vector.load %arg2[%c0, %c0_1, %c0_2] : memref<7x8x128xf32, #tpu.memory_space<vmem>>, vector<1x8x128xf32>
    %4 = vector.shape_cast %3 : vector<1x8x128xf32> to vector<8x128xf32>
    %c1 = arith.constant 1 : index
    %c0_3 = arith.constant 0 : index
    %c0_4 = arith.constant 0 : index
    %5 = vector.load %arg2[%c1, %c0_3, %c0_4] : memref<7x8x128xf32, #tpu.memory_space<vmem>>, vector<1x8x128xf32>
    %6 = vector.shape_cast %5 : vector<1x8x128xf32> to vector<8x128xf32>
    %c2 = arith.constant 2 : index
    %c0_5 = arith.constant 0 : index
    %c0_6 = arith.constant 0 : index
    %7 = vector.load %arg2[%c2, %c0_5, %c0_6] : memref<7x8x128xf32, #tpu.memory_space<vmem>>, vector<1x8x128xf32>
    %8 = vector.shape_cast %7 : vector<1x8x128xf32> to vector<8x128xf32>
    %c3 = arith.constant 3 : index
    %c0_7 = arith.constant 0 : index
    %c0_8 = arith.constant 0 : index
    %9 = vector.load %arg2[%c3, %c0_7, %c0_8] : memref<7x8x128xf32, #tpu.memory_space<vmem>>, vector<1x8x128xf32>
    %10 = vector.shape_cast %9 : vector<1x8x128xf32> to vector<8x128xf32>
    %c4 = arith.constant 4 : index
    %c0_9 = arith.constant 0 : index
    %c0_10 = arith.constant 0 : index
    %11 = vector.load %arg2[%c4, %c0_9, %c0_10] : memref<7x8x128xf32, #tpu.memory_space<vmem>>, vector<1x8x128xf32>
    %12 = vector.shape_cast %11 : vector<1x8x128xf32> to vector<8x128xf32>
    %c5 = arith.constant 5 : index
    %c0_11 = arith.constant 0 : index
    %c0_12 = arith.constant 0 : index
    %13 = vector.load %arg2[%c5, %c0_11, %c0_12] : memref<7x8x128xf32, #tpu.memory_space<vmem>>, vector<1x8x128xf32>
    %14 = vector.shape_cast %13 : vector<1x8x128xf32> to vector<8x128xf32>
    %c6 = arith.constant 6 : index
    %c0_13 = arith.constant 0 : index
    %c0_14 = arith.constant 0 : index
    %15 = vector.load %arg2[%c6, %c0_13, %c0_14] : memref<7x8x128xf32, #tpu.memory_space<vmem>>, vector<1x8x128xf32>
    %16 = vector.shape_cast %15 : vector<1x8x128xf32> to vector<8x128xf32>
    %17 = arith.mulf %4, %10 : vector<8x128xf32>
    %18 = arith.mulf %6, %12 : vector<8x128xf32>
    %19 = arith.addf %17, %18 : vector<8x128xf32>
    %20 = arith.mulf %8, %14 : vector<8x128xf32>
    %21 = arith.addf %19, %20 : vector<8x128xf32>
    %22 = arith.mulf %21, %10 : vector<8x128xf32>
    %23 = arith.subf %4, %22 : vector<8x128xf32>
    %24 = arith.mulf %21, %12 : vector<8x128xf32>
    %25 = arith.subf %6, %24 : vector<8x128xf32>
    %26 = arith.mulf %21, %14 : vector<8x128xf32>
    %27 = arith.subf %8, %26 : vector<8x128xf32>
    %28 = arith.mulf %23, %23 : vector<8x128xf32>
    %29 = arith.mulf %25, %25 : vector<8x128xf32>
    %30 = arith.addf %28, %29 : vector<8x128xf32>
    %31 = arith.mulf %27, %27 : vector<8x128xf32>
    %32 = arith.addf %30, %31 : vector<8x128xf32>
    %33 = math.sqrt %32 : vector<8x128xf32>
    %cst = arith.constant 1.000000e-16 : f32
    %34 = vector.broadcast %cst : f32 to vector<8x128xf32>
    %35 = arith.maximumf %32, %34 : vector<8x128xf32>
    %36 = tpu.reciprocal %35 : vector<8x128xf32> -> vector<8x128xf32>
    %37 = arith.mulf %30, %36 : vector<8x128xf32>
    %cst_15 = arith.constant 9.99999974E-5 : f32
    %38 = vector.broadcast %cst_15 : f32 to vector<8x128xf32>
    %39 = arith.addf %37, %38 : vector<8x128xf32>
    %40 = math.sqrt %39 : vector<8x128xf32>
    %41 = arith.mulf %16, %40 : vector<8x128xf32>
    %42 = arith.mulf %41, %33 : vector<8x128xf32>
    %cst_16 = arith.constant 5.000000e-01 : f32
    %43 = vector.broadcast %cst_16 : f32 to vector<8x128xf32>
    %44 = arith.mulf %42, %43 : vector<8x128xf32>
    %c0_17 = arith.constant 0 : index
    %c0_18 = arith.constant 0 : index
    %45 = vector.load %arg3[%c0_17, %c0_18] : memref<8x128xf32, #tpu.memory_space<vmem>>, vector<8x128xf32>
    tpu.vector_store %arg3[%c0_17, %c0_18], %44 {strides = array<i32>} : memref<8x128xf32, #tpu.memory_space<vmem>>, vector<8x128xf32>,
    %c0_19 = arith.constant 0 : index
    %c0_20 = arith.constant 0 : index
    %c0_21 = arith.constant 0 : index
    %46 = vector.load %arg4[%c0_19, %c0_20, %c0_21] : memref<1x8x128xf32, #tpu.memory_space<vmem>>, vector<1x8x128xf32>
    %47 = vector.shape_cast %42 : vector<8x128xf32> to vector<1x8x128xf32>
    %48 = arith.addf %46, %47 : vector<1x8x128xf32>
    %c0_22 = arith.constant 0 : index
    %c0_23 = arith.constant 0 : index
    %c0_24 = arith.constant 0 : index
    %49 = vector.load %arg4[%c0_22, %c0_23, %c0_24] : memref<1x8x128xf32, #tpu.memory_space<vmem>>, vector<1x8x128xf32>
    tpu.vector_store %arg4[%c0_22, %c0_23, %c0_24], %48 {strides = array<i32>} : memref<1x8x128xf32, #tpu.memory_space<vmem>>, vector<1x8x128xf32>,
    return
  }
  func.func @transform_0(%arg0: i32, %arg1: i32) -> (i32, i32, i32) {
    %c1_i32 = arith.constant 1 : i32
    %0 = arith.muli %arg0, %c1_i32 : i32
    %1 = arith.addi %0, %arg1 : i32
    %c0_i32 = arith.constant 0 : i32
    %c0_i32_0 = arith.constant 0 : i32
    %c0_i32_1 = arith.constant 0 : i32
    return %c0_i32, %1, %c0_i32_0 : i32, i32, i32
  }
  func.func @transform_1(%arg0: i32, %arg1: i32) -> (i32, i32) {
    %c1_i32 = arith.constant 1 : i32
    %0 = arith.muli %arg0, %c1_i32 : i32
    %1 = arith.addi %0, %arg1 : i32
    %c0_i32 = arith.constant 0 : i32
    %c0_i32_0 = arith.constant 0 : i32
    return %1, %c0_i32 : i32, i32
  }
  func.func @transform_2(%arg0: i32, %arg1: i32) -> (i32, i32, i32) {
    %c0_i32 = arith.constant 0 : i32
    %c0_i32_0 = arith.constant 0 : i32
    %c0_i32_1 = arith.constant 0 : i32
    return %arg0, %c0_i32, %c0_i32_0 : i32, i32, i32
  }
}

</mosaic_0001>

<bundles_post_ra>
// kernel: tpu_custom_call.1
= control target key start
LH: loop header
LB: loop body
LE: loop exit
PB: predicated region body
PF: predicated region fallthrough
CT: control target
= control target key end

     0   :  { %8 = vsyncpa [#allocation3], 0  ;;  %s262_s0 = inlined_call_operand.hbm [shape: f32[7,8,128], index: 0, kind: input, shape index: {}]   ;;  %s263_s1 = inlined_call_operand.hbm [shape: f32[8,128], index: 1, kind: output, shape index: {0}]   ;;  %s264_s2 = inlined_call_operand.hbm [shape: f32[1,8,128], index: 2, kind: output, shape index: {1}]  }
   0x1   :  { %9 = vsyncpa [#allocation4], 0 }
   0x2   :  { %10 = vsyncpa [#allocation7], 0  ;;  %s206_s9 = smov [#allocation2]   ;;  %s134_s13 = scalar_lea.hbm %s262_s0, 896 }
   0x3   :  { %s19_s10 = sshll.u32 %s206_s9, 4  ;;  %p135_p0 = scmp.ne.s32.totalorder %s262_s0, %s134_s13  ;;  %s20_s10 = int_to_ptr.vmem [resolvable:$true] %s19_s10 }
   0x4   :  { %p138_p1 = scmp.lt.u32.totalorder %s134_s13, %s262_s0 }
   0x6   :  { %p140_p2 = pnand %p138_p1, %p135_p0 }
   0x8   :  { %143 = shalt.err (!%p140_p2)
}
   0x9   :  { %s144_s18 = scalar_lea.vmem %s20_s10, 896  ;;  %p149_p4 = scmp.lt.s32.totalorder %s20_s10, %s20_s10 }
   0xa   :  { %p145_p3 = scmp.ne.s32.totalorder %s20_s10, %s144_s18  ;;  %p150_p5 = scmp.lt.s32.totalorder %s144_s18, %s144_s18 }
   0xc   :  { %p151_p6 = por %p150_p5, %p149_p4 }
   0xe   :  { %p152_p7 = pnand %p151_p6, %p145_p3 }
  0x10   :  { %155 = shalt.err (!%p152_p7)
}
  0x11   :  { %s207_s19 = smov 128   ;;  %s208_s20 = smov 8  }
  0x12   :  { %25 = dma.hbm_to_vmem [thread:$0]  %s262_s0, 896, %s20_s10, [#allocation3], %s207_s19, %s207_s19, %s208_s20  }
  0x13   :  { %200 = dma.done.wait [#allocation3], 896  }
  0x14   :  { %201 = vsyncadd [#allocation3], 4294966400  ;;  %v36_v0 = vld [vmem:[#allocation2] sm:$0xff]  ;;  %v38_v1 = vld [vmem:[#allocation2 + $0x8] sm:$0xff]  ;;  %s209_s0 = smov [#allocation5]   ;;  %s210_s24 = smov [#allocation6]  }
  0x15   :  { %v40_v2 = vld [vmem:[#allocation2 + $0x10] sm:$0xff]  ;;  %v42_v3 = vld [vmem:[#allocation2 + $0x18] sm:$0xff]  ;;  %v44_v4 = vld [vmem:[#allocation2 + $0x20] sm:$0xff]  ;;  %s99_s23 = sshll.u32 %s209_s0, 4  ;;  %s109_s25 = sshll.u32 %s210_s24, 4  ;;  %s100_s23 = int_to_ptr.vmem [resolvable:$true] %s99_s23  ;;  %s110_s25 = int_to_ptr.vmem [resolvable:$true] %s109_s25 }
  0x16   :  { %v46_v5 = vld [vmem:[#allocation2 + $0x28] sm:$0xff]  ;;  %v49_v6 = vmul.f32 %v42_v3, %v36_v0  ;;  %v50_v7 = vmul.f32 %v44_v4, %v38_v1  ;;  %v48_v33 = vld [vmem:[#allocation2 + $0x30] sm:$0xff]  ;;  %s156_s26 = scalar_lea.vmem %s100_s23, 128  ;;  %p161_p9 = scmp.lt.s32.totalorder %s100_s23, %s100_s23 }
  0x17   :  { %v52_v8 = vmul.f32 %v46_v5, %v40_v2  ;;  %p157_p8 = scmp.ne.s32.totalorder %s100_s23, %s156_s26  ;;  %p162_p10 = scmp.lt.s32.totalorder %s156_s26, %s156_s26 }
  0x18   :  { %v51_v9 = vadd.f32 %v50_v7, %v49_v6 }
  0x19   :  { %p163_p11 = por %p162_p10, %p161_p9 }
  0x1a   :  { %v53_v10 = vadd.f32 %v52_v8, %v51_v9 }
  0x1b   :  { %p164_p12 = pnand %p163_p11, %p157_p8 }
  0x1c   :  { %v54_v11 = vmul.f32 %v53_v10, %v42_v3  ;;  %v56_v12 = vmul.f32 %v53_v10, %v44_v4  ;;  %v58_v13 = vmul.f32 %v53_v10, %v46_v5 }
  0x1e   :  { %v55_v14 = vsub.f32 %v36_v0, %v54_v11  ;;  %v57_v15 = vsub.f32 %v38_v1, %v56_v12  ;;  %v59_v16 = vsub.f32 %v40_v2, %v58_v13 }
  0x20   :  { %v60_v17 = vmul.f32 %v55_v14, %v55_v14  ;;  %v61_v18 = vmul.f32 %v57_v15, %v57_v15  ;;  %v63_v19 = vmul.f32 %v59_v16, %v59_v16 }
  0x22   :  { %v62_v20 = vadd.f32 %v61_v18, %v60_v17 }
  0x24   :  { %v64_v21 = vadd.f32 %v63_v19, %v62_v20 }
  0x26   :  { %v72_v22 = vmax.f32 %v64_v21, 1e-16  ;;  %vm67_vm0 = vcmp.eq.f32.partialorder %v64_v21, inf  ;;  %v70_v29 = vand.u32 2147483648, %v64_v21  ;;  %vm69_vm2 = vcmp.eq.f32.partialorder %v64_v21, 0.0 }
  0x28   :  { %128 = vrcp.f32 %v72_v22 }
  0x29   :  { %130 = vrsqrt.f32 %v64_v21 }
  0x32   :  { %v129_v23 = vpop.eup %128 }
  0x33   :  { %v74_v24 = vmul.f32 %v129_v23, %v62_v20  ;;  %v131_v26 = vpop.eup %130 }
  0x34   :  { %v66_v27 = vmul.f32 %v131_v26, %v64_v21 }
  0x35   :  { %v75_v25 = vadd.f32 0.0001, %v74_v24 }
  0x36   :  { %v68_v31 = vsel %vm67_vm0, %v64_v21, %v66_v27 }
  0x37   :  { %132 = vrsqrt.f32 %v75_v25  ;;  %vm78_vm1 = vcmp.eq.f32.partialorder %v75_v25, inf  ;;  %v81_v30 = vand.u32 2147483648, %v75_v25  ;;  %vm80_vm3 = vcmp.eq.f32.partialorder %v75_v25, 0.0 }
  0x38   :  { %v71_v35 = vsel %vm69_vm2, %v70_v29, %v68_v31 }
  0x41   :  { %v133_v28 = vpop.eup %132 }
  0x42   :  { %v77_v32 = vmul.f32 %v133_v28, %v75_v25 }
  0x44   :  { %v79_v34 = vsel %vm78_vm1, %v75_v25, %v77_v32 }
  0x45   :  { %v82_v36 = vsel %vm80_vm3, %v81_v30, %v79_v34 }
  0x46   :  { %v83_v37 = vmul.f32 %v82_v36, %v48_v33 }
  0x48   :  { %v84_v38 = vmul.f32 %v83_v37, %v71_v35 }
  0x4a   :  { %v85_v39 = vmul.f32 0.5, %v84_v38  ;;  %89 = vst [vmem:[#allocation6] sm:$0xff] %v84_v38 }
  0x4c   :  { %86 = vst [vmem:[#allocation5] sm:$0xff] %v85_v39 }
  0x4d   :  { %167 = shalt.err (!%p164_p12)
}
  0x4e   :  { %s168_s29 = scalar_lea.hbm %s263_s1, 128 }
  0x4f   :  { %p169_p13 = scmp.ne.s32.totalorder %s263_s1, %s168_s29  ;;  %p172_p0 = scmp.lt.u32.totalorder %s168_s29, %s263_s1 }
  0x51   :  { %p174_p1 = pnand %p172_p0, %p169_p13 }
  0x53   :  { %177 = shalt.err (!%p174_p1)
}
  0x54   :  { %102 = dma.vmem_to_hbm [thread:$0]  %s100_s23, 128, %s263_s1, [#allocation4]  }
  0x55   :  { %s178_s8 = scalar_lea.vmem %s110_s25, 128  ;;  %p183_p3 = scmp.lt.s32.totalorder %s110_s25, %s110_s25 }
  0x56   :  { %p179_p2 = scmp.ne.s32.totalorder %s110_s25, %s178_s8  ;;  %p184_p4 = scmp.lt.s32.totalorder %s178_s8, %s178_s8 }
  0x58   :  { %p185_p5 = por %p184_p4, %p183_p3 }
  0x5a   :  { %p186_p6 = pnand %p185_p5, %p179_p2 }
  0x5c   :  { %189 = shalt.err (!%p186_p6)
}
  0x5d   :  { %s190_s11 = scalar_lea.hbm %s264_s2, 128 }
  0x5e   :  { %p191_p7 = scmp.ne.s32.totalorder %s264_s2, %s190_s11  ;;  %p194_p8 = scmp.lt.u32.totalorder %s190_s11, %s264_s2 }
  0x60   :  { %p196_p9 = pnand %p194_p8, %p191_p7 }
  0x62   :  { %199 = shalt.err (!%p196_p9)
}
  0x63   :  { %112 = dma.vmem_to_hbm [thread:$0]  %s110_s25, 128, %s264_s2, [#allocation7]  }
  0x64   :  { %202 = dma.done.wait [#allocation4], 128  }
  0x65   :  { %203 = vsyncadd [#allocation4], 4294967168 }
  0x66   :  { %204 = dma.done.wait [#allocation7], 128  }
  0x67   :  { %205 = vsyncadd [#allocation7], 4294967168 }
  0x68   :  { %119 = vsyncpa [#allocation3], 1 }
  0x69   :  { %120 = vsyncpa [#allocation4], 1 }
  0x6a   :  { %121 = vsyncpa [#allocation7], 1 }

</bundles_post_ra>
